<compile_context>
chip_gen: v6e
topology: v6e:2x2x1
jax: 0.10.0
libtpu: 0.0.40
codegen_flags: <defaults>
</compile_context>

<pallas_src>
import jax
import jax.numpy as jnp
from jax.experimental import pallas as pl
from jax.experimental.pallas import tpu as pltpu


def _round_up(n, m):
    return ((n + m - 1) // m) * m


def _cdiv(a, b):
    return (a + b - 1) // b


def baseball_fcn_kernel(
    x_ref,        # [TB, F]   streamed at HBM dtype (f32)
    w1_ref,       # [F, H]    bn1-folded fc1 weight (compute dtype)
    b1_ref,       # [1, H]    bn1-folded fc1 bias (f32)
    w2_ref,       # [H, H]    bn2-folded fc2 weight (compute dtype)
    b2_ref,       # [1, H]    bn2-folded fc2 bias (f32)
    w6_ref,       # [H, 1]    fc6 weight column (compute dtype)
    b6_ref,       # [1, 1]    fc6 bias (f32)
    o_ref,        # [TB, 1]
):
    # Cast the streamed input to the MXU compute dtype here (VPU has huge
    # slack) instead of a separate XLA astype op in the wrapper.
    x = x_ref[...].astype(w1_ref.dtype)

    # fc1 + bn1 (folded) + relu  -- f32 accumulation on the MXU.
    h = jnp.dot(x, w1_ref[...], preferred_element_type=jnp.float32) + b1_ref[...]
    h = jnp.maximum(h, 0.0)

    # dropout(p=0.2): identity in inference mode.
    # TODO(synk): training-mode dropout (stochastic mask) not implemented.

    # fc2 + bn2 (folded) + relu.
    h = jnp.dot(h.astype(w2_ref.dtype), w2_ref[...],
                preferred_element_type=jnp.float32) + b2_ref[...]
    h = jnp.maximum(h, 0.0)

    # dropout(p=0.2): identity in inference mode.

    # fc6 + relu on the MXU (N=1 column; Mosaic pads lanes internally). The
    # previous keepdims lane-reduce burned the shared vector-extended slot
    # that vmatmul also needs.
    y = jnp.dot(h.astype(w6_ref.dtype), w6_ref[...],
                preferred_element_type=jnp.float32) + b6_ref[...]
    o_ref[...] = jnp.maximum(y, 0.0).astype(o_ref.dtype)
    # NOTE: output stays a [TB, 1] column (masked stores). It is ~1/F of HBM
    # traffic, so the lane-dense relayout / block-diagonal 8-row packing
    # rewrite was deliberately not taken (only worth it if bundle analysis
    # shows vex/vld saturation after these fixes).


def baseball_fcn_forward(x, params, *, block_b=4096, compute_dtype=jnp.bfloat16):
    """x: [B, n_features] float32. params: dict of weights (see init_params)."""
    B, F = x.shape
    H = params["w2"].shape[0]
    eps = 1e-5

    # Fold BatchNorm (eval mode) into the linear weights / biases, in f32,
    # casting to the compute dtype last.
    s1 = params["bn1_gamma"] / jnp.sqrt(params["bn1_var"] + eps)
    s2 = params["bn2_gamma"] / jnp.sqrt(params["bn2_var"] + eps)
    w1f = (params["w1"] * s1[None, :]).astype(compute_dtype)
    b1f = ((params["b1"] - params["bn1_mean"]) * s1 + params["bn1_beta"]).reshape(1, H)
    w2f = (params["w2"] * s2[None, :]).astype(compute_dtype)
    b2f = ((params["b2"] - params["bn2_mean"]) * s2 + params["bn2_beta"]).reshape(1, H)
    w6c = params["w6"].reshape(H, 1).astype(compute_dtype)   # MXU column
    b6 = params["b6"].reshape(1, 1).astype(jnp.float32)

    # Batch tile: as large as practical (amortize ~0.35 us grid-step overhead)
    # but keep >= 4 grid steps when B allows, so the "parallel" batch axis can
    # shard across both TensorCores on v7x. Must be a multiple of 8 (sublane).
    # No padding of x: Pallas handles the ragged last block (rows independent,
    # out-of-bounds rows are never written to the output).
    tb = min(block_b, max(8, _round_up(_cdiv(B, 4), 8)))
    grid = (_cdiv(B, tb),)

    weight_bytes = sum(int(a.size * a.dtype.itemsize)
                       for a in (w1f, b1f, w2f, b2f, w6c, b6))
    cost = pl.CostEstimate(
        flops=2 * B * (F * H + H * H + H),
        transcendentals=0,
        bytes_accessed=int(x.size * x.dtype.itemsize) + B * 4 + weight_bytes,
    )

    out = pl.pallas_call(
        baseball_fcn_kernel,
        out_shape=jax.ShapeDtypeStruct((B, 1), jnp.float32),
        grid=grid,
        in_specs=[
            pl.BlockSpec((tb, F), lambda i: (i, 0)),   # x: streamed per tile
            pl.BlockSpec((F, H), lambda i: (0, 0)),    # weights: resident
            pl.BlockSpec((1, H), lambda i: (0, 0)),    # (constant block index
            pl.BlockSpec((H, H), lambda i: (0, 0)),    #  -> DMA'd once; no
            pl.BlockSpec((1, H), lambda i: (0, 0)),    #  re-fetch per step)
            pl.BlockSpec((H, 1), lambda i: (0, 0)),
            pl.BlockSpec((1, 1), lambda i: (0, 0)),
        ],
        out_specs=pl.BlockSpec((tb, 1), lambda i: (i, 0)),
        compiler_params=pltpu.CompilerParams(
            dimension_semantics=("parallel",),
            vmem_limit_bytes=48 * 1024 * 1024,
        ),
        cost_estimate=cost,
    )(x, w1f, b1f, w2f, b2f, w6c, b6)

    return out


def init_params(key, n_features, hidden_size):
    """Deterministic synthetic parameters (PyTorch default-init-like ranges)."""
    ks = jax.random.split(key, 8)

    def linear(k, fan_in, fan_out):
        kw, kb = jax.random.split(k)
        bound = 1.0 / jnp.sqrt(fan_in)
        # stored as [in, out] (transposed vs. torch's [out, in])
        w = jax.random.uniform(kw, (fan_in, fan_out), jnp.float32, -bound, bound)
        b = jax.random.uniform(kb, (fan_out,), jnp.float32, -bound, bound)
        return w, b

    w1, b1 = linear(ks[0], n_features, hidden_size)
    w2, b2 = linear(ks[1], hidden_size, hidden_size)
    w6, b6 = linear(ks[2], hidden_size, 1)

    # BatchNorm params: deterministic but non-trivial so the fold is exercised.
    bn1_gamma = 1.0 + 0.1 * jax.random.normal(ks[3], (hidden_size,), jnp.float32)
    bn1_beta = 0.05 * jax.random.normal(ks[4], (hidden_size,), jnp.float32)
    bn1_mean = 0.1 * jax.random.normal(ks[5], (hidden_size,), jnp.float32)
    bn1_var = jnp.abs(1.0 + 0.1 * jax.random.normal(ks[6], (hidden_size,), jnp.float32))
    bn2_gamma = 1.0 + 0.1 * jax.random.normal(ks[7], (hidden_size,), jnp.float32)
    bn2_beta = jnp.zeros((hidden_size,), jnp.float32)
    bn2_mean = jnp.zeros((hidden_size,), jnp.float32)
    bn2_var = jnp.ones((hidden_size,), jnp.float32)

    return dict(
        w1=w1, b1=b1, w2=w2, b2=b2, w6=w6, b6=b6,
        bn1_gamma=bn1_gamma, bn1_beta=bn1_beta, bn1_mean=bn1_mean, bn1_var=bn1_var,
        bn2_gamma=bn2_gamma, bn2_beta=bn2_beta, bn2_mean=bn2_mean, bn2_var=bn2_var,
    )


def reference_forward(x, params):
    """Pure-JAX f32 reference with identical semantics (for sanity check)."""
    eps = 1e-5
    h = x @ params["w1"] + params["b1"]
    h = (h - params["bn1_mean"]) / jnp.sqrt(params["bn1_var"] + eps)
    h = h * params["bn1_gamma"] + params["bn1_beta"]
    h = jnp.maximum(h, 0.0)
    h = h @ params["w2"] + params["b2"]
    h = (h - params["bn2_mean"]) / jnp.sqrt(params["bn2_var"] + eps)
    h = h * params["bn2_gamma"] + params["bn2_beta"]
    h = jnp.maximum(h, 0.0)
    y = h @ params["w6"] + params["b6"]
    return jnp.maximum(y, 0.0)


if __name__ == "__main__":
    n_features = 16
    hidden_size = 32
    batch = 8

    key = jax.random.PRNGKey(0)
    kx, kp = jax.random.split(key)
    x = jax.random.normal(kx, (batch, n_features), jnp.float32)
    params = init_params(kp, n_features, hidden_size)
    ref = reference_forward(x, params)

    # f32 path: near-exact semantics check (MXU f32 matmuls, f32 fold).
    out_f32 = jax.block_until_ready(
        baseball_fcn_forward(x, params, compute_dtype=jnp.float32))
    assert out_f32.shape == (batch, 1), out_f32.shape
    assert jnp.allclose(out_f32, ref, atol=1e-4, rtol=1e-4), "f32 mismatch vs reference"

    # bf16 MXU path (default): loosened tolerance vs the f32 reference.
    out_bf16 = jax.block_until_ready(baseball_fcn_forward(x, params))
    assert out_bf16.shape == (batch, 1), out_bf16.shape
    assert jnp.allclose(out_bf16, ref, atol=3e-2, rtol=3e-2), "bf16 mismatch vs reference"

    # Ragged batch (exercises Pallas partial last-block handling: no jnp.pad,
    # multiple grid steps, out-of-bounds rows never stored).
    x2 = jax.random.normal(jax.random.PRNGKey(1), (13, n_features), jnp.float32)
    ref2 = reference_forward(x2, params)
    out2 = jax.block_until_ready(baseball_fcn_forward(x2, params))
    assert out2.shape == (13, 1), out2.shape
    assert jnp.allclose(out2, ref2, atol=3e-2, rtol=3e-2), "ragged-batch mismatch"

    print("KERNEL_OK")
</pallas_src>

<mosaic_0001>
module attributes {stable_mosaic.version = 11 : i64} {
  func.func @baseball_fcn_kernel(%arg0: i32, %arg1: memref<8x16xf32, #tpu.memory_space<vmem>>, %arg2: memref<16x32xf32, #tpu.memory_space<vmem>>, %arg3: memref<1x32xf32, #tpu.memory_space<vmem>>, %arg4: memref<32x32xf32, #tpu.memory_space<vmem>>, %arg5: memref<1x32xf32, #tpu.memory_space<vmem>>, %arg6: memref<32x1xf32, #tpu.memory_space<vmem>>, %arg7: memref<1x1xf32, #tpu.memory_space<vmem>>, %arg8: memref<8x1xf32, #tpu.memory_space<vmem>>) attributes {dimension_semantics = [#tpu.dimension_semantics<parallel>], iteration_bounds = array<i64: 1>, scalar_prefetch = 0 : i64, scratch_operands = 0 : i64, tpu.core_type = #tpu.core_type<tc>, window_params = [{transform_indices = @transform_0, window_bounds = array<i64: 8, 16>}, {pipeline_mode = #tpu.pipeline_mode<synchronous>, transform_indices = @transform_1, window_bounds = array<i64: 16, 32>}, {pipeline_mode = #tpu.pipeline_mode<synchronous>, transform_indices = @transform_2, window_bounds = array<i64: 1, 32>}, {pipeline_mode = #tpu.pipeline_mode<synchronous>, transform_indices = @transform_3, window_bounds = array<i64: 32, 32>}, {pipeline_mode = #tpu.pipeline_mode<synchronous>, transform_indices = @transform_4, window_bounds = array<i64: 1, 32>}, {pipeline_mode = #tpu.pipeline_mode<synchronous>, transform_indices = @transform_5, window_bounds = array<i64: 32, 1>}, {pipeline_mode = #tpu.pipeline_mode<synchronous>, transform_indices = @transform_6, window_bounds = array<i64: 1, 1>}, {transform_indices = @transform_7, window_bounds = array<i64: 8, 1>}]} {
    %c0 = arith.constant 0 : index
    %c0_0 = arith.constant 0 : index
    %0 = vector.load %arg1[%c0, %c0_0] : memref<8x16xf32, #tpu.memory_space<vmem>>, vector<8x16xf32>
    %c0_1 = arith.constant 0 : index
    %c0_2 = arith.constant 0 : index
    %1 = vector.load %arg2[%c0_1, %c0_2] : memref<16x32xf32, #tpu.memory_space<vmem>>, vector<16x32xf32>
    %cst = arith.constant dense<0.000000e+00> : vector<8x32xf32>
    %2 = tpu.matmul %0, %1, %cst {dimension_numbers = #tpu.dot_dimension_numbers<[1], [0], [0], [1], [0, 0, 1, 1], [], []>} : vector<8x16xf32>, vector<16x32xf32>, vector<8x32xf32> -> vector<8x32xf32>
    %c0_3 = arith.constant 0 : index
    %c0_4 = arith.constant 0 : index
    %3 = vector.load %arg3[%c0_3, %c0_4] : memref<1x32xf32, #tpu.memory_space<vmem>>, vector<1x32xf32>
    %4 = vector.broadcast %3 : vector<1x32xf32> to vector<8x32xf32>
    %5 = arith.addf %2, %4 : vector<8x32xf32>
    %cst_5 = arith.constant 0.000000e+00 : f32
    %6 = vector.broadcast %cst_5 : f32 to vector<8x32xf32>
    %7 = arith.maximumf %5, %6 : vector<8x32xf32>
    %c0_6 = arith.constant 0 : index
    %c0_7 = arith.constant 0 : index
    %8 = vector.load %arg4[%c0_6, %c0_7] : memref<32x32xf32, #tpu.memory_space<vmem>>, vector<32x32xf32>
    %cst_8 = arith.constant dense<0.000000e+00> : vector<8x32xf32>
    %9 = tpu.matmul %7, %8, %cst_8 {dimension_numbers = #tpu.dot_dimension_numbers<[1], [0], [0], [1], [0, 0, 1, 1], [], []>} : vector<8x32xf32>, vector<32x32xf32>, vector<8x32xf32> -> vector<8x32xf32>
    %c0_9 = arith.constant 0 : index
    %c0_10 = arith.constant 0 : index
    %10 = vector.load %arg5[%c0_9, %c0_10] : memref<1x32xf32, #tpu.memory_space<vmem>>, vector<1x32xf32>
    %11 = vector.broadcast %10 : vector<1x32xf32> to vector<8x32xf32>
    %12 = arith.addf %9, %11 : vector<8x32xf32>
    %cst_11 = arith.constant 0.000000e+00 : f32
    %13 = vector.broadcast %cst_11 : f32 to vector<8x32xf32>
    %14 = arith.maximumf %12, %13 : vector<8x32xf32>
    %c0_12 = arith.constant 0 : index
    %c0_13 = arith.constant 0 : index
    %15 = vector.load %arg6[%c0_12, %c0_13] : memref<32x1xf32, #tpu.memory_space<vmem>>, vector<32x1xf32>
    %cst_14 = arith.constant dense<0.000000e+00> : vector<8x1xf32>
    %16 = tpu.matmul %14, %15, %cst_14 {dimension_numbers = #tpu.dot_dimension_numbers<[1], [0], [0], [1], [0, 0, 1, 1], [], []>} : vector<8x32xf32>, vector<32x1xf32>, vector<8x1xf32> -> vector<8x1xf32>
    %c0_15 = arith.constant 0 : index
    %c0_16 = arith.constant 0 : index
    %17 = vector.load %arg7[%c0_15, %c0_16] : memref<1x1xf32, #tpu.memory_space<vmem>>, vector<1x1xf32>
    %18 = vector.broadcast %17 : vector<1x1xf32> to vector<8x1xf32>
    %19 = arith.addf %16, %18 : vector<8x1xf32>
    %cst_17 = arith.constant 0.000000e+00 : f32
    %20 = vector.broadcast %cst_17 : f32 to vector<8x1xf32>
    %21 = arith.maximumf %19, %20 : vector<8x1xf32>
    %c0_18 = arith.constant 0 : index
    %c0_19 = arith.constant 0 : index
    %22 = vector.load %arg8[%c0_18, %c0_19] : memref<8x1xf32, #tpu.memory_space<vmem>>, vector<8x1xf32>
    tpu.vector_store %arg8[%c0_18, %c0_19], %21 {strides = array<i32>} : memref<8x1xf32, #tpu.memory_space<vmem>>, vector<8x1xf32>,
    return
  }
  func.func @transform_0(%arg0: i32) -> (i32, i32) {
    %c0_i32 = arith.constant 0 : i32
    %c0_i32_0 = arith.constant 0 : i32
    return %arg0, %c0_i32 : i32, i32
  }
  func.func @transform_1(%arg0: i32) -> (i32, i32) {
    %c0_i32 = arith.constant 0 : i32
    %c0_i32_0 = arith.constant 0 : i32
    %c0_i32_1 = arith.constant 0 : i32
    return %c0_i32, %c0_i32_0 : i32, i32
  }
  func.func @transform_2(%arg0: i32) -> (i32, i32) {
    %c0_i32 = arith.constant 0 : i32
    %c0_i32_0 = arith.constant 0 : i32
    %c0_i32_1 = arith.constant 0 : i32
    return %c0_i32, %c0_i32_0 : i32, i32
  }
  func.func @transform_3(%arg0: i32) -> (i32, i32) {
    %c0_i32 = arith.constant 0 : i32
    %c0_i32_0 = arith.constant 0 : i32
    %c0_i32_1 = arith.constant 0 : i32
    return %c0_i32, %c0_i32_0 : i32, i32
  }
  func.func @transform_4(%arg0: i32) -> (i32, i32) {
    %c0_i32 = arith.constant 0 : i32
    %c0_i32_0 = arith.constant 0 : i32
    %c0_i32_1 = arith.constant 0 : i32
    return %c0_i32, %c0_i32_0 : i32, i32
  }
  func.func @transform_5(%arg0: i32) -> (i32, i32) {
    %c0_i32 = arith.constant 0 : i32
    %c0_i32_0 = arith.constant 0 : i32
    %c0_i32_1 = arith.constant 0 : i32
    return %c0_i32, %c0_i32_0 : i32, i32
  }
  func.func @transform_6(%arg0: i32) -> (i32, i32) {
    %c0_i32 = arith.constant 0 : i32
    %c0_i32_0 = arith.constant 0 : i32
    %c0_i32_1 = arith.constant 0 : i32
    return %c0_i32, %c0_i32_0 : i32, i32
  }
  func.func @transform_7(%arg0: i32) -> (i32, i32) {
    %c0_i32 = arith.constant 0 : i32
    %c0_i32_0 = arith.constant 0 : i32
    return %arg0, %c0_i32 : i32, i32
  }
}

</mosaic_0001>

<bundles_post_ra>
// kernel: tpu_custom_call.1
= control target key start
LH: loop header
LB: loop body
LE: loop exit
PB: predicated region body
PF: predicated region fallthrough
CT: control target
= control target key end

     0   :  { %s509_s0 = inlined_call_operand.vmem [shape: f32[8,16], index: 0, kind: input, shape index: {}]   ;;  %s510_s1 = inlined_call_operand.hbm [shape: f32[16,32], index: 1, kind: input, shape index: {}]   ;;  %s511_s2 = inlined_call_operand.hbm [shape: f32[1,32], index: 2, kind: input, shape index: {}]   ;;  %s512_s3 = inlined_call_operand.vmem [shape: f32[32,32], index: 3, kind: input, shape index: {}]   ;;  %s513_s4 = inlined_call_operand.vmem [shape: f32[1,32], index: 4, kind: input, shape index: {}]   ;;  %s514_s5 = inlined_call_operand.vmem [shape: f32[32,1], index: 5, kind: input, shape index: {}]   ;;  %s515_s6 = inlined_call_operand.<no memory space> [shape: f32[1,1], index: 6, kind: input, shape index: {}]   ;;  %s516_s7 = inlined_call_operand.vmem [shape: f32[8,1], index: 7, kind: output, shape index: {}]  }
   0x1   :  { %v12_v0 = vstv %s515_s6 }
   0x2   :  { %13 = vst [vmem:[#allocation2] sm:$0x1] %v12_v0 }
   0x3   :  { %14 = vsyncpa [#allocation4], 0 }
   0x4   :  { %15 = vsyncpa [#allocation6], 0  ;;  %s416_s26 = smov [#allocation3]  }
   0x5   :  { %s23_s27 = sshll.u32 %s416_s26, 4  ;;  %s24_s27 = int_to_ptr.vmem [resolvable:$true] %s23_s27 }
   0x6   :  { %s380_s28 = scalar_lea.vmem %s24_s27, 256  ;;  %p385_p1 = scmp.lt.s32.totalorder %s24_s27, %s24_s27 }
   0x7   :  { %p381_p0 = scmp.ne.s32.totalorder %s24_s27, %s380_s28  ;;  %p386_p2 = scmp.lt.s32.totalorder %s380_s28, %s380_s28 }
   0x9   :  { %p387_p3 = por %p386_p2, %p385_p1 }
   0xb   :  { %p388_p4 = pnand %p387_p3, %p381_p0 }
   0xd   :  { %391 = shalt.err (!%p388_p4)
}
   0xe   :  { %s417_s29 = smov 128   ;;  %s418_s30 = smov 8  }
   0xf   :  { %29 = dma.hbm_to_vmem [thread:$0]  %s510_s1, 256, %s24_s27, [#allocation4], %s417_s29, %s417_s29, %s418_s30  }
  0x10   :  { %s419_s6 = smov [#allocation5]  }
  0x11   :  { %s36_s10 = sshll.u32 %s419_s6, 4  ;;  %s37_s10 = int_to_ptr.vmem [resolvable:$true] %s36_s10 }
  0x12   :  { %s400_s11 = scalar_lea.vmem %s37_s10, 16  ;;  %s404_s12 = scalar_lea.vmem %s37_s10, 32 }
  0x13   :  { %p401_p5 = scmp.ne.s32.totalorder %s37_s10, %s400_s11  ;;  %p405_p6 = scmp.lt.s32.totalorder %s37_s10, %s37_s10 }
  0x14   :  { %p406_p7 = scmp.lt.s32.totalorder %s404_s12, %s400_s11 }
  0x16   :  { %p407_p8 = por %p406_p7, %p405_p6 }
  0x18   :  { %p408_p9 = pnand %p407_p8, %p401_p5 }
  0x1a   :  { %411 = shalt.err (!%p408_p9)
}
  0x1b   :  { %39 = dma.hbm_to_vmem [thread:$0]  %s511_s2, 16, %s37_s10, [#allocation6]  }
  0x1c   :  { %412 = dma.done.wait [#allocation4], 256  }
  0x1d   :  { %413 = vsyncadd [#allocation4], 4294967040 }
  0x1e   :  { %414 = dma.done.wait [#allocation6], 16  }
  0x1f   :  { %415 = vsyncadd [#allocation6], 4294967280  ;;  %v420_v1 = vmov 0.0   ;;  %vm421_vm0 = vmmov 0   ;;  %v56_v2 = vld [vmem:[#allocation3 + $0x8] sm:$0xff]  ;;  %v55_v3 = vld [vmem:[#allocation3] sm:$0xff] }
  0x20   :  { %337 = vmatprep.subr.mxu0 %v420_v1  ;;  %341 = vmatprep.mubr.msk.f32.mxu0 %vm421_vm0, %v420_v1  ;;  %v54_v4 = vld [vmem:[%s509_s0] sm:$0xff]  ;;  %vm64_vm1 = vcmask 130048   ;;  %v142_v5 = vld [vmem:[%s512_s3 + $0x18] sm:$0xff]  ;;  %v141_v6 = vld [vmem:[%s512_s3 + $0x10] sm:$0xff]  ;;  %vm150_vm2 = vcmask 261120   ;;  %vm310_vm3 = vcmask 7168  }
  0x21   :  { %344 = vmatprep.subr.mxu1 %v420_v1  ;;  %352 = vmatprep.mubr.msk.f32.mxu1 %vm421_vm0, %v420_v1  ;;  %v140_v7 = vld [vmem:[%s512_s3 + $0x8] sm:$0xff]  ;;  %v139_v8 = vld [vmem:[%s512_s3] sm:$0xff]  ;;  %v228_v9 = vld [vmem:[%s514_s5 + $0x18] sm:$0xff] }
  0x22   :  { %338 = vmatpush3.msra.mxu0 %v56_v2  ;;  %345 = vmatpush3.msra.mxu1 %v142_v5  ;;  %v318_v10 = vld [vmem:[#allocation5] ss:$0 sm:$0xff]  ;;  %v226_v16 = vld [vmem:[%s514_s5 + $0x8] sm:$0xff]  ;;  %v225_v17 = vld [vmem:[%s514_s5] sm:$0xff] }
  0x23   :  { %339 = vmatprep.subr.mxu0 %v420_v1  ;;  %346 = vmatprep.subr.mxu1 %v420_v1  ;;  %v227_v15 = vld [vmem:[%s514_s5 + $0x10] sm:$0xff]  ;;  %v320_v18 = vld [vmem:[%s513_s4] ss:$0 sm:$0xff] }
  0x24   :  { %340 = vmatpush3.msra.mxu0 %v55_v3  ;;  %347 = vmatpush3.msra.mxu1 %v141_v6  ;;  %v322_v23 = vld [vmem:[#allocation2] ss:$0 sm:$0xff] }
  0x25   :  { %342 = vmatmul.mubr.msk.f32.vlgmr.msra.gmra.mxu0 %vm64_vm1, %v54_v4  ;;  %355 = vmatprep.subr.mxu0 %v420_v1 }
  0x26   :  { %363 = vmatprep.mubr.msk.f32.mxu0 %vm421_vm0, %v420_v1  ;;  %348 = vmatprep.subr.mxu1 %v420_v1 }
  0x27   :  { %349 = vmatpush3.msra.mxu1 %v140_v7  ;;  %356 = vmatpush3.msra.mxu0 %v228_v9 }
  0x28   :  { %350 = vmatprep.subr.mxu1 %v420_v1  ;;  %357 = vmatprep.subr.mxu0 %v420_v1 }
  0x29   :  { %351 = vmatpush3.msra.mxu1 %v139_v8  ;;  %358 = vmatpush3.msra.mxu0 %v227_v15 }
  0x2a   :  { %359 = vmatprep.subr.mxu0 %v420_v1 }
  0x2b   :  { %360 = vmatpush3.msra.mxu0 %v226_v16 }
  0x2c   :  { %361 = vmatprep.subr.mxu0 %v420_v1 }
  0x2d   :  { %362 = vmatpush3.msra.mxu0 %v225_v17 }
  0xe5   :  { %v134_v11 = vpop.f32.mrf.mxu0 }
  0xe6   :  { %v135_v12 = vadd.f32 %v318_v10, %v134_v11 }
  0xe7   :  { %v343_v13 = vpop.f32.mrf.mxu0 }
  0xe8   :  { %v138_v14 = vmax.f32 %v135_v12, 0.0 }
  0xea   :  { %353 = vmatmul.mubr.msk.f32.vlgmr.msra.gmra.mxu1 %vm150_vm2, %v138_v14 }
 0x1aa   :  { %v220_v19 = vpop.f32.mrf.mxu1 }
 0x1ab   :  { %v221_v20 = vadd.f32 %v320_v18, %v220_v19 }
 0x1ac   :  { %v354_v21 = vpop.f32.mrf.mxu1 }
 0x1ad   :  { %v224_v22 = vmax.f32 %v221_v20, 0.0 }
 0x1af   :  { %364 = vmatmul.mubr.msk.f32.vlgmr.msra.gmra.mxu0 %vm150_vm2, %v224_v22 }
 0x26f   :  { %v305_v24 = vpop.f32.mrf.mxu0 }
 0x270   :  { %v306_v25 = vadd.f32 %v322_v23, %v305_v24 }
 0x271   :  { %v365_v26 = vpop.f32.mrf.mxu0 }
 0x272   :  { %v309_v27 = vmax.f32 %v306_v25, 0.0 }
 0x274   :  { %311 = vst.msk [vmem:[%s516_s7] sm:$0xff] %vm310_vm3, %v309_v27 }
 0x275   :  { %316 = vsyncpa [#allocation4], 1 }
 0x276   :  { %317 = vsyncpa [#allocation6], 1 }

</bundles_post_ra>
